<compile_context>
chip_gen: v6e
topology: v6e:2x2x1
jax: 0.10.0
libtpu: 0.0.40
codegen_flags: <defaults>
</compile_context>

<pallas_src>
import functools

import jax
import jax.numpy as jnp
from jax.experimental import pallas as pl
from jax.experimental.pallas import tpu as pltpu

EPSILON = 1e-07


def _cdiv(a, b):
    return -(-a // b)


def _round_up(x, m):
    return _cdiv(x, m) * m


def _vmem_budget():
    """Per-generation (budget_for_block_sizing, vmem_limit_bytes)."""
    try:
        cap = int(pltpu.get_tpu_info().vmem_capacity_bytes)
    except Exception:
        cap = 64 * 1024 * 1024          # conservative (v7x-sized) fallback
    budget = min(cap // 2, 64 * 1024 * 1024)
    limit = min((cap * 3) // 4, 96 * 1024 * 1024)
    return budget, limit


def _plan_blocks(extent, unit, elems_per_unit, c_pad, esz, budget, max_tile,
                 want_even):
    """Pick (block, chunks) along the spatial axis.

    `extent` is in rows (packed layout, unit=8, 128 elems/row) or lanes (flat
    layout, unit=128, 1 elem/lane).  `block` is a multiple of `unit` unless it
    equals the full extent.  If `want_even`, try to make `chunks` even (>= 2)
    so the spatial axis can be split into two parallel halves for v7x's two
    TensorCores (best effort).
    """
    # Working-set estimate per spatial element: double-buffered pred + label
    # tiles plus headroom for the in-kernel f32 temporaries.
    per_elem = 2 * (c_pad * esz + 32) + 24 * c_pad
    cap = budget // (per_elem * elems_per_unit)
    cap = min(cap, 131072 // elems_per_unit)     # keep per-step codegen sane
    if max_tile is not None:
        cap = min(cap, max(1, max_tile // elems_per_unit))
    cap = max(unit, (cap // unit) * unit)
    if extent <= cap and not (want_even and extent >= 2 * unit):
        return extent, 1
    chunks = _cdiv(extent, cap)
    if want_even and chunks % 2:
        chunks += 1
    block = min(cap, max(unit, _round_up(_cdiv(extent, chunks), unit)))
    return block, _cdiv(extent, block)


def _iou_partials_kernel(lab_ref, pred_ref, out_ref, *,
                         block_extent, total_extent, chunks_per_split,
                         needs_mask):
    sp = pl.program_id(1)
    k = pl.program_id(2)

    @pl.when(k == 0)
    def _init():
        out_ref[...] = jnp.zeros_like(out_ref)

    pred = pred_ref[0].astype(jnp.float32)   # packed: (C, SUB, 128); flat: (C, TS)
    lab = lab_ref[0]                         # packed: (1, SUB, 128); flat: (1, TS)

    if needs_mask:
        # Global offset (rows for the packed layout, lanes for the flat one)
        # of this block.  Out-of-range elements are unspecified HBM data and
        # must contribute nothing to either running sum.
        start = (sp * chunks_per_split + k) * block_extent
        offs = jax.lax.broadcasted_iota(jnp.int32, lab.shape, 1) + start
        valid = offs < total_extent
        lab = jnp.where(valid, lab, -1)           # -1 never matches a class id
        pred = jnp.where(valid, pred, 0.0)

    class_ids = jax.lax.broadcasted_iota(jnp.int32, pred.shape, 0)
    onehot = lab == class_ids                     # broadcast (1, ...) vs (C, ...)
    inter = jnp.where(onehot, pred, 0.0)          # y_true * y_pred
    tp = jnp.where(onehot, pred + 1.0, pred)      # y_true + y_pred

    def _reduce_tail(x):
        # Reduce everything but the class axis; fold the second-minor axis
        # first (cheap vreg adds) and finish with one lane reduce per class.
        while x.ndim > 2:
            x = jnp.sum(x, axis=1)
        return jnp.sum(x, axis=-1, keepdims=True)           # (C, 1)

    part = jnp.concatenate([_reduce_tail(inter), _reduce_tail(tp)], axis=1)
    out_ref[...] += part[None, None]                          # (1, 1, C, 2)


def iou_loss(y_true, y_pred, *, num_classes=None, max_tile=None):
    """IoU loss matching PyTorch IOULoss.forward.

    Args:
      y_true: (B, W, H) integer ground-truth labels.
      y_pred: (B, C, W, H) float (f32 or bf16) class probabilities
              (softmax already applied along C).
      max_tile: optional cap on spatial elements per block (testing knob).
    Returns:
      scalar float32 loss.
    """
    B, C, W, H = y_pred.shape
    if num_classes is not None:
        assert C == num_classes, (C, num_classes)
    assert y_true.shape == (B, W, H), y_true.shape
    S = W * H

    esz = jnp.dtype(y_pred.dtype).itemsize
    c_pad = max(8, _round_up(C, 8))
    budget, vmem_limit = _vmem_budget()

    # v7x shards only "parallel" grid axes across its two TensorCores; with an
    # odd batch we also split the spatial reduction into two parallel halves.
    want_even = (B % 2 == 1)

    packed = (S % 128 == 0)
    if packed:
        rows = S // 128
        block, chunks = _plan_blocks(rows, 8, 128, c_pad, esz, budget,
                                     max_tile, want_even)
        total_extent = rows
        pred_in = y_pred.reshape(B, C, rows, 128)
        lab_in = y_true.astype(jnp.int32).reshape(B, 1, rows, 128)
        pred_block = (1, C, block, 128)
        lab_block = (1, 1, block, 128)
    else:
        block, chunks = _plan_blocks(S, 128, 1, c_pad, esz, budget,
                                     max_tile, want_even)
        total_extent = S
        pred_in = y_pred.reshape(B, C, S)
        lab_in = y_true.astype(jnp.int32).reshape(B, 1, S)
        pred_block = (1, C, block)
        lab_block = (1, 1, block)

    if want_even and chunks >= 2 and chunks % 2 == 0:
        n_split, cps = 2, chunks // 2
    else:
        n_split, cps = 1, chunks
    needs_mask = (block * chunks != total_extent)

    if len(pred_block) == 4:
        in_map = lambda b, sp, k: (b, 0, sp * cps + k, 0)
    else:
        in_map = lambda b, sp, k: (b, 0, sp * cps + k)
    out_map = lambda b, sp, k: (b, sp, 0, 0)

    kernel = functools.partial(
        _iou_partials_kernel,
        block_extent=block, total_extent=total_extent,
        chunks_per_split=cps, needs_mask=needs_mask)

    partials = pl.pallas_call(
        kernel,
        out_shape=jax.ShapeDtypeStruct((B, n_split, C, 2), jnp.float32),
        grid_spec=pltpu.PrefetchScalarGridSpec(
            num_scalar_prefetch=0,
            grid=(B, n_split, cps),
            in_specs=[
                pl.BlockSpec(lab_block, in_map),     # labels
                pl.BlockSpec(pred_block, in_map),    # probabilities
            ],
            out_specs=pl.BlockSpec((1, 1, C, 2), out_map),
        ),
        compiler_params=pltpu.CompilerParams(
            dimension_semantics=("parallel", "parallel", "arbitrary"),
            vmem_limit_bytes=vmem_limit,
        ),
    )(lab_in, pred_in)

    sums = jnp.sum(partials, axis=(0, 1))        # (C, 2)
    intersection = sums[:, 0]
    union = sums[:, 1] - intersection            # sum(true + pred) - inter
    iou = (intersection + EPSILON) / (union + EPSILON)
    return jnp.sum(-jnp.log(iou)) / (B * W * H * C)


def _reference_iou_loss(y_true, y_pred, num_classes):
    # Pure-JAX reference mirroring the PyTorch module.
    y_true_oh = jax.nn.one_hot(y_true.astype(jnp.int32), num_classes,
                               dtype=jnp.float32)
    y_pred_p = jnp.transpose(y_pred, (0, 2, 3, 1)).astype(jnp.float32)
    intersection = jnp.sum(y_true_oh * y_pred_p, axis=(0, 1, 2))
    union = jnp.sum(y_true_oh + y_pred_p, axis=(0, 1, 2)) - intersection
    iou = (intersection + EPSILON) / (union + EPSILON)
    b, w, h, c = y_true_oh.shape
    return jnp.sum(-jnp.log(iou)) / (b * w * h * c)


if __name__ == "__main__":
    base_key = jax.random.PRNGKey(0)

    def make_case(key, B, C, W, H, dtype):
        k1, k2 = jax.random.split(key)
        y_true = jax.random.randint(k1, (B, W, H), 0, C, dtype=jnp.int32)
        logits = jax.random.normal(k2, (B, C, W, H), dtype=jnp.float32)
        y_pred = jax.nn.softmax(logits, axis=1).astype(dtype)
        return y_true, y_pred

    #        name,                       B, C,  W,  H,  dtype,        max_tile
    cases = [
        ("packed_single_chunk",          2, 4, 16, 16, jnp.float32,   None),
        ("flat_masked_multichunk",       2, 4, 17, 19, jnp.float32,   128),
        ("odd_batch_parallel_split",     1, 3, 32, 64, jnp.float32,   None),
        ("packed_tiny_rows",             1, 4, 16, 24, jnp.float32,   None),
        ("packed_masked_multichunk",     2, 4, 32, 48, jnp.float32,   1024),
        ("bf16_pred",                    2, 4, 16, 16, jnp.bfloat16,  None),
    ]

    for i, (name, B, C, W, H, dtype, max_tile) in enumerate(cases):
        y_true, y_pred = make_case(jax.random.fold_in(base_key, i),
                                   B, C, W, H, dtype)
        got = jax.block_until_ready(
            iou_loss(y_true, y_pred, num_classes=C, max_tile=max_tile))
        want = _reference_iou_loss(y_true, y_pred.astype(jnp.float32), C)
        assert jnp.allclose(got, want, rtol=1e-5, atol=1e-6), (name, got, want)

    print("KERNEL_OK")
</pallas_src>

<mosaic_0001>
module attributes {stable_mosaic.version = 11 : i64} {
  func.func @_iou_partials_kernel(%arg0: i32, %arg1: i32, %arg2: i32, %arg3: memref<1x1x2x128xi32, #tpu.memory_space<vmem>>, %arg4: memref<1x4x2x128xf32, #tpu.memory_space<vmem>>, %arg5: memref<1x1x4x2xf32, #tpu.memory_space<vmem>>) attributes {dimension_semantics = [#tpu.dimension_semantics<parallel>, #tpu.dimension_semantics<parallel>, #tpu.dimension_semantics<arbitrary>], iteration_bounds = array<i64: 2, 1, 1>, scalar_prefetch = 0 : i64, scratch_operands = 0 : i64, tpu.core_type = #tpu.core_type<tc>, window_params = [{transform_indices = @transform_0, window_bounds = array<i64: 1, 1, 2, 128>}, {transform_indices = @transform_1, window_bounds = array<i64: 1, 4, 2, 128>}, {transform_indices = @transform_2, window_bounds = array<i64: 1, 1, 4, 2>}]} {
    %c0_i32 = arith.constant 0 : i32
    %0 = arith.cmpi eq, %arg2, %c0_i32 : i32
    %1 = arith.extui %0 : i1 to i32
    %c0_i32_0 = arith.constant 0 : i32
    %2 = arith.cmpi ne, %1, %c0_i32_0 : i32
    scf.if %2 {
      %cst_21 = arith.constant 0.000000e+00 : f32
      %26 = vector.broadcast %cst_21 : f32 to vector<1x1x4x2xf32>
      %c0_22 = arith.constant 0 : index
      %c0_23 = arith.constant 0 : index
      %c0_24 = arith.constant 0 : index
      %c0_25 = arith.constant 0 : index
      %27 = vector.load %arg5[%c0_22, %c0_23, %c0_24, %c0_25] : memref<1x1x4x2xf32, #tpu.memory_space<vmem>>, vector<1x1x4x2xf32>
      tpu.vector_store %arg5[%c0_22, %c0_23, %c0_24, %c0_25], %26 {strides = array<i32>} : memref<1x1x4x2xf32, #tpu.memory_space<vmem>>, vector<1x1x4x2xf32>,
    } else {
    }
    %c0 = arith.constant 0 : index
    %c0_1 = arith.constant 0 : index
    %c0_2 = arith.constant 0 : index
    %c0_3 = arith.constant 0 : index
    %3 = vector.load %arg4[%c0, %c0_1, %c0_2, %c0_3] : memref<1x4x2x128xf32, #tpu.memory_space<vmem>>, vector<1x4x2x128xf32>
    %4 = vector.shape_cast %3 : vector<1x4x2x128xf32> to vector<4x2x128xf32>
    %c0_4 = arith.constant 0 : index
    %c0_5 = arith.constant 0 : index
    %c0_6 = arith.constant 0 : index
    %c0_7 = arith.constant 0 : index
    %5 = vector.load %arg3[%c0_4, %c0_5, %c0_6, %c0_7] : memref<1x1x2x128xi32, #tpu.memory_space<vmem>>, vector<1x1x2x128xi32>
    %6 = vector.shape_cast %5 : vector<1x1x2x128xi32> to vector<1x2x128xi32>
    %7 = tpu.iota {dimensions = array<i32: 0>} : vector<4x2x128xi32>
    %8 = vector.broadcast %6 : vector<1x2x128xi32> to vector<4x2x128xi32>
    %9 = arith.cmpi eq, %8, %7 : vector<4x2x128xi32>
    %cst = arith.constant 0.000000e+00 : f32
    %10 = vector.broadcast %cst : f32 to vector<4x2x128xf32>
    %11 = arith.select %9, %4, %10 : vector<4x2x128xi1>, vector<4x2x128xf32>
    %cst_8 = arith.constant 1.000000e+00 : f32
    %12 = vector.broadcast %cst_8 : f32 to vector<4x2x128xf32>
    %13 = arith.addf %4, %12 : vector<4x2x128xf32>
    %14 = arith.select %9, %13, %4 : vector<4x2x128xi1>, vector<4x2x128xf32>
    %cst_9 = arith.constant dense<0.000000e+00> : vector<4x128xf32>
    %15 = vector.multi_reduction <add>, %11, %cst_9 [1] : vector<4x2x128xf32> to vector<4x128xf32>
    %cst_10 = arith.constant dense<0.000000e+00> : vector<4xf32>
    %16 = vector.multi_reduction <add>, %15, %cst_10 [1] : vector<4x128xf32> to vector<4xf32>
    %17 = vector.shape_cast %16 : vector<4xf32> to vector<4x1xf32>
    %cst_11 = arith.constant dense<0.000000e+00> : vector<4x128xf32>
    %18 = vector.multi_reduction <add>, %14, %cst_11 [1] : vector<4x2x128xf32> to vector<4x128xf32>
    %cst_12 = arith.constant dense<0.000000e+00> : vector<4xf32>
    %19 = vector.multi_reduction <add>, %18, %cst_12 [1] : vector<4x128xf32> to vector<4xf32>
    %20 = vector.shape_cast %19 : vector<4xf32> to vector<4x1xf32>
    %21 = tpu.concatenate %17, %20 in 1 : vector<4x1xf32>, vector<4x1xf32> -> vector<4x2xf32>
    %c0_13 = arith.constant 0 : index
    %c0_14 = arith.constant 0 : index
    %c0_15 = arith.constant 0 : index
    %c0_16 = arith.constant 0 : index
    %22 = vector.load %arg5[%c0_13, %c0_14, %c0_15, %c0_16] : memref<1x1x4x2xf32, #tpu.memory_space<vmem>>, vector<1x1x4x2xf32>
    %23 = vector.shape_cast %21 : vector<4x2xf32> to vector<1x1x4x2xf32>
    %24 = arith.addf %22, %23 : vector<1x1x4x2xf32>
    %c0_17 = arith.constant 0 : index
    %c0_18 = arith.constant 0 : index
    %c0_19 = arith.constant 0 : index
    %c0_20 = arith.constant 0 : index
    %25 = vector.load %arg5[%c0_17, %c0_18, %c0_19, %c0_20] : memref<1x1x4x2xf32, #tpu.memory_space<vmem>>, vector<1x1x4x2xf32>
    tpu.vector_store %arg5[%c0_17, %c0_18, %c0_19, %c0_20], %24 {strides = array<i32>} : memref<1x1x4x2xf32, #tpu.memory_space<vmem>>, vector<1x1x4x2xf32>,
    return
  }
  func.func @transform_0(%arg0: i32, %arg1: i32, %arg2: i32) -> (i32, i32, i32, i32) {
    %c1_i32 = arith.constant 1 : i32
    %0 = arith.muli %arg1, %c1_i32 : i32
    %1 = arith.addi %0, %arg2 : i32
    %c0_i32 = arith.constant 0 : i32
    %c0_i32_0 = arith.constant 0 : i32
    %c0_i32_1 = arith.constant 0 : i32
    return %arg0, %c0_i32, %1, %c0_i32_0 : i32, i32, i32, i32
  }
  func.func @transform_1(%arg0: i32, %arg1: i32, %arg2: i32) -> (i32, i32, i32, i32) {
    %c1_i32 = arith.constant 1 : i32
    %0 = arith.muli %arg1, %c1_i32 : i32
    %1 = arith.addi %0, %arg2 : i32
    %c0_i32 = arith.constant 0 : i32
    %c0_i32_0 = arith.constant 0 : i32
    %c0_i32_1 = arith.constant 0 : i32
    return %arg0, %c0_i32, %1, %c0_i32_0 : i32, i32, i32, i32
  }
  func.func @transform_2(%arg0: i32, %arg1: i32, %arg2: i32) -> (i32, i32, i32, i32) {
    %c0_i32 = arith.constant 0 : i32
    %c0_i32_0 = arith.constant 0 : i32
    %c0_i32_1 = arith.constant 0 : i32
    return %arg0, %arg1, %c0_i32, %c0_i32_0 : i32, i32, i32, i32
  }
}

</mosaic_0001>

<bundles_post_ra>
// kernel: tpu_custom_call.1
= control target key start
LH: loop header
LB: loop body
LE: loop exit
PB: predicated region body
PF: predicated region fallthrough
CT: control target
= control target key end

     0   :  { %7 = vsyncpa [#allocation3], 0  ;;  %s833_s0 = inlined_call_operand.hbm [shape: s32[2,1,2,128], index: 0, kind: input, shape index: {}]   ;;  %s834_s1 = inlined_call_operand.hbm [shape: f32[2,4,2,128], index: 1, kind: input, shape index: {}]   ;;  %s835_s2 = inlined_call_operand.vmem [shape: f32[2,1,4,2], index: 2, kind: output, shape index: {}]  }
   0x1   :  { %9 = vsyncpa [#allocation3 + $0x1], 0 }
   0x2   :  { %10 = vsyncpa [#allocation5], 0 }
   0x3   :  { %12 = vsyncpa [#allocation5 + $0x1], 0  ;;  %s681_s9 = smov 0   ;;  %s683_s10 = smov 0  }
   0x4   :  { %s685_s11 = smov 0   ;;  %s687_s12 = smov 0  }
   0x5   :  { %s689_s13 = smov 0   ;;  %s691_s14 = smov 0  }
   0x6 LB: > { %s470_s15 = sadd.s32 4294967295, %s659_s14   ;;  %s37_s16 = sadd.s32 1, %s655_s13  ;;  %s659_s14 = sphi %s691_s14, %s18_s14   ;;  %s655_s13 = sphi %s689_s13, %s844_s13   ;;  %s651_s12 = sphi %s687_s12, %s843_s12   ;;  %s647_s11 = sphi %s685_s11, %s842_s11   ;;  %s643_s10 = sphi %s683_s10, %s841_s10   ;;  %s639_s9 = sphi %s681_s9, %s840_s9  }
   0x7   : > { %p39_p0 = scmp.ge.s32.totalorder %s37_s16, 2  ;;  %s48_s17 = sadd.s32 1, %s647_s11 }
   0x8   : > { %p55_p1 = scmp.ne.s32.totalorder %s647_s11, %s643_s10  ;;  %p56_p2 = scmp.eq.s32.totalorder %s659_s14, 0 }
   0x9   : > { %s846_s16 = smov (%p39_p0, %s37_s16), 0  ;;  %p61_p4 = scmp.ne.s32.totalorder %s643_s10, %s639_s9 }
   0xa   : > { %p717_p3 = por %p56_p2, %p55_p1  ;;  %s43_s19 = ssub.s32 %s655_s13, %s846_s16 }
   0xb   : > { %p62_p5 = scmp.eq.s32.totalorder %s470_s15, 0  ;;  %p46_p6 = scmp.eq.s32.totalorder %s43_s19, 0 }
   0xc   : > { %p497_p8 = scmp.lt.s32.totalorder %s659_s14, 2  ;;  %s733_s22 = sand.u32 1, %s647_s11  }
   0xd   : > { %p724_p7 = por %p62_p5, %p61_p4  ;;  %s475_s23 = sshll.u32 %s655_s13, 5 }
   0xe   : > { %s730_s21 = scalar_select %p46_p6, %s647_s11, %s48_s17  }
   0xf   : > { %s474_s24 = sshll.u32 %s733_s22, 1  ;;  %s154_s27 = scalar_lea.hbm %s833_s0, %s475_s23 }
  0x10   : > { %s147_s28 = scalar_lea.vmem [#allocation2], %s474_s24  ;;  %p742_p9 = pnand %p497_p8, %p717_p3 }
  0x11   : > { %s156_s29 = sshll.u32 %s147_s28, 4  ;;  %p479_p10 = scmp.ge.s32.totalorder %s659_s14, 1  ;;  %s157_s29 = int_to_ptr.vmem [resolvable:$true] %s156_s29 }
  0x12   : > { %p184_p11 = scmp.lt.s32.totalorder %s659_s14, 3  ;;  %s144_s3 = scalar_lea.sflag [#allocation3], %s733_s22 }
  0x13   : > { %p551_p12 = pneg %p742_p9  ;;  %s562_s4 = scalar_lea.vmem %s157_s29, 32 }
  0x14   : > { %p563_p13 = scmp.ne.s32.totalorder %s157_s29, %s562_s4  ;;  %s661_s5 = smov [#allocation2]  }
  0x15   : > { %s567_s6 = sshll.u32 %s661_s5, 4  ;;  %s568_s6 = int_to_ptr.vmem [resolvable:$false] %s567_s6 }
  0x16   : > { %p565_p0 = pnand %p563_p13, %p551_p12  ;;  %s569_s7 = scalar_lea.vmem %s568_s6, 64 }
  0x17   : > { %p570_p2 = scmp.lt.s32.totalorder %s157_s29, %s568_s6  ;;  %p571_p3 = scmp.lt.s32.totalorder %s569_s7, %s562_s4 }
  0x18   : > { %p566_p1 = pneg %p565_p0 }
  0x19   : > { %p572_p4 = por %p571_p3, %p570_p2 }
  0x1b   : > { %p573_p5 = pnand %p572_p4, %p566_p1 }
  0x1d   : > { %576 = shalt.err (!%p573_p5)
}
  0x1e   : > { %493 = dma.hbm_to_vmem [thread:$0]  (!%p742_p9), %s154_s27, 32, %s157_s29, %s144_s3  }
  0x1f   : > { %p760_p6 = pnand %p479_p10, %p184_p11  ;;  %s476_s9 = sshll.u32 %s733_s22, 3 }
  0x20   : > { %s485_s15 = sshll.u32 %s655_s13, 7  ;;  %s167_s23 = scalar_lea.vmem [#allocation4], %s476_s9 }
  0x21   : > { %s175_s19 = scalar_lea.hbm %s834_s1, %s485_s15  ;;  %s176_s24 = sshll.u32 %s167_s23, 4  ;;  %s177_s24 = int_to_ptr.vmem [resolvable:$true] %s176_s24 }
  0x22   : > { %s164_s25 = scalar_lea.sflag [#allocation5], %s733_s22  ;;  %s590_s26 = scalar_lea.vmem %s177_s24, 128 }
  0x23   : > { %p591_p8 = scmp.ne.s32.totalorder %s177_s24, %s590_s26  ;;  %s662_s27 = smov [#allocation4]  }
  0x24   : > { %s595_s28 = sshll.u32 %s662_s27, 4  ;;  %s596_s28 = int_to_ptr.vmem [resolvable:$false] %s595_s28 }
  0x25   : > { %p593_p13 = pnand %p591_p8, %p551_p12  ;;  %s597_s29 = scalar_lea.vmem %s596_s28, 256 }
  0x26   : > { %p598_p10 = scmp.lt.s32.totalorder %s177_s24, %s596_s28  ;;  %p599_p11 = scmp.lt.s32.totalorder %s597_s29, %s590_s26 }
  0x27   : > { %p594_p0 = pneg %p593_p13 }
  0x28   : > { %p600_p1 = por %p599_p11, %p598_p10 }
  0x2a   : > { %p601_p2 = pnand %p600_p1, %p594_p0 }
  0x2c   : > { %604 = shalt.err (!%p601_p2)
}
  0x2d   : > { %s663_s3 = smov 32   ;;  %s664_s4 = smov 2  }
  0x2e   : > { %496 = dma.hbm_to_vmem [thread:$0]  (!%p742_p9), %s175_s19, 128, %s177_s24, %s164_s25, %s663_s3, %s663_s3, %s664_s4  }
  0x2f   : > { %188 = sbr.rel (%p760_p6) target bundleno = 226 (0xe2), region = 28  ;;  %s190_s22 = sand.u32 (!%p760_p6), 1, %s643_s10  }
  0x30   : > { %s480_s5 = sshll.u32 (!%p760_p6), %s190_s22, 1  ;;  %s191_s6 = scalar_lea.sflag (!%p760_p6), [#allocation3], %s190_s22 }
  0x31   : > { %s194_s7 = scalar_lea.vmem (!%p760_p6), [#allocation2], %s480_s5 }
  0x34   : > { %630 = dma.done.wait (%p724_p7), %s191_s6, 32  }
  0x35   : > { %632 = vsyncadd (%p724_p7), %s191_s6, 4294967264  ;;  %s481_s9 = sshll.u32 %s190_s22, 3  ;;  %s200_s15 = scalar_lea.sflag [#allocation5], %s190_s22 }
  0x36   : > { %s203_s17 = scalar_lea.vmem [#allocation4], %s481_s9 }
  0x37   : > { %634 = dma.done.wait (%p724_p7), %s200_s15, 128  }
  0x38   : > { %636 = vsyncadd (%p724_p7), %s200_s15, 4294967168  ;;  %vm267_vm0 = vcmask 1041408   ;;  %v246_v0 = vld [vmem:[%s203_s17] sm:$0x3]  ;;  %v247_v1 = vld [vmem:[%s203_s17 + $0x2] sm:$0x3] }
  0x39   : > { %v248_v2 = vld [vmem:[%s203_s17 + $0x4] sm:$0x3]  ;;  %v249_v3 = vld [vmem:[%s203_s17 + $0x6] sm:$0x3]  ;;  %v250_v4 = vld [vmem:[%s194_s7] sm:$0x3] }
  0x3a   : > { %v259_v5 = vadd.f32 1.0, %v246_v0  ;;  %v260_v6 = vadd.f32 1.0, %v247_v1  ;;  %vm251_vm1 = vcmp.eq.s32.totalorder %v250_v4, 0  ;;  %vm252_vm2 = vcmp.eq.s32.totalorder %v250_v4, 1  ;;  %p233_p7 = scmp.lt.s32.totalorder %s651_s12, 1 }
  0x3b   : > { %vm253_vm3 = vcmp.eq.s32.totalorder %v250_v4, 2  ;;  %vm254_vm4 = vcmp.eq.s32.totalorder %v250_v4, 3  ;;  %v255_v7 = vsel %vm251_vm1, %v246_v0, 0.0  ;;  %v256_v8 = vsel %vm252_vm2, %v247_v1, 0.0 }
  0x3c   : > { %v257_v9 = vsel %vm253_vm3, %v248_v2, 0.0  ;;  %v258_v10 = vsel %vm254_vm4, %v249_v3, 0.0  ;;  %v261_v11 = vadd.f32 1.0, %v248_v2  ;;  %v262_v12 = vadd.f32 1.0, %v249_v3  ;;  %s848_s12 = smov (!%p233_p7, %s651_s12), 1 }
  0x3d   : > { %v268_v13 = vsel %vm267_vm0, %v255_v7, 0.0  ;;  %v275_v14 = vsel %vm267_vm0, %v256_v8, 0.0  ;;  %v282_v17 = vsel %vm267_vm0, %v257_v9, 0.0  ;;  %v289_v18 = vsel %vm267_vm0, %v258_v10, 0.0  ;;  %s482_s20 = sshll.u32 %s848_s12, 2 }
  0x3e   : > { %v269_v15 = vrot.slane %v268_v13, 4  ;;  %v276_v16 = vrot.slane %v275_v14, 4  ;;  %v283_v19 = vrot.slane %v282_v17, 4  ;;  %v290_v20 = vrot.slane %v289_v18, 4  ;;  %s239_s18 = scalar_lea.vmem %s835_s2, %s482_s20 }
  0x3f   : > { %vm300_vm5 = vcmask 1041409   ;;  %v263_v21 = vsel %vm251_vm1, %v259_v5, %v246_v0  ;;  %v264_v22 = vsel %vm252_vm2, %v260_v6, %v247_v1  ;;  %vm302_vm6 = vcmask 1042434  }
  0x40   : > { %v270_v23 = vadd.f32 %v269_v15, %v268_v13  ;;  %v277_v24 = vadd.f32 %v276_v16, %v275_v14  ;;  %v265_v25 = vsel %vm253_vm3, %v261_v11, %v248_v2  ;;  %v266_v26 = vsel %vm254_vm4, %v262_v12, %v249_v3 }
  0x41   : > { %v284_v27 = vadd.f32 %v283_v19, %v282_v17  ;;  %v291_v28 = vadd.f32 %v290_v20, %v289_v18  ;;  %vm304_vm7 = vcmask 1043459   ;;  %v311_v29 = vsel %vm267_vm0, %v263_v21, 0.0 }
  0x42   : > { %v318_v30 = vsel %vm267_vm0, %v264_v22, 0.0  ;;  %v271_v31 = vrot.slane %v270_v23, 2  ;;  %v278_v32 = vrot.slane %v277_v24, 2  ;;  %v312_v33 = vrot.slane %v311_v29, 4 }
  0x43   : > { %v319_v34 = vrot.slane %v318_v30, 4  ;;  %v285_v35 = vrot.slane %v284_v27, 2  ;;  %v292_v36 = vrot.slane %v291_v28, 2  ;;  %v325_v37 = vsel %vm267_vm0, %v265_v25, 0.0 }
  0x44   : > { %v332_v38 = vsel %vm267_vm0, %v266_v26, 0.0  ;;  %v272_v39 = vadd.f32 %v271_v31, %v270_v23  ;;  %v279_v40 = vadd.f32 %v278_v32, %v277_v24  ;;  %v313_v41 = vadd.f32 %v312_v33, %v311_v29 }
  0x45   : > { %v320_v42 = vadd.f32 %v319_v34, %v318_v30  ;;  %v286_v43 = vadd.f32 %v285_v35, %v284_v27  ;;  %v293_v44 = vadd.f32 %v292_v36, %v291_v28  ;;  %v326_v45 = vrot.slane %v325_v37, 4 }
  0x46   : > { %v333_v46 = vrot.slane %v332_v38, 4  ;;  %v273_v47 = vrot.slane %v272_v39, 1  ;;  %v280_v48 = vrot.slane %v279_v40, 1  ;;  %v314_v49 = vrot.slane %v313_v41, 2 }
  0x47   : > { %v321_v50 = vrot.slane %v320_v42, 2  ;;  %v287_v51 = vrot.slane %v286_v43, 1  ;;  %v294_v52 = vrot.slane %v293_v44, 1  ;;  %v327_v53 = vadd.f32 %v326_v45, %v325_v37 }
  0x48   : > { %v334_v54 = vadd.f32 %v333_v46, %v332_v38  ;;  %v274_v55 = vadd.f32 %v273_v47, %v272_v39  ;;  %v281_v56 = vadd.f32 %v280_v48, %v279_v40  ;;  %v315_v57 = vadd.f32 %v314_v49, %v313_v41 }
  0x49   : > { %v322_v58 = vadd.f32 %v321_v50, %v320_v42  ;;  %v288_v59 = vadd.f32 %v287_v51, %v286_v43  ;;  %v295_v60 = vadd.f32 %v294_v52, %v293_v44  ;;  %v328_v61 = vrot.slane %v327_v53, 2 }
  0x4a   : > { %v335_v62 = vrot.slane %v334_v54, 2  ;;  %v301_v63 = vsel %vm300_vm5, %v281_v56, %v274_v55  ;;  %vm307_vm8 = vcmask 1043456   ;;  %v316_v0 = vrot.slane %v315_v57, 1 }
  0x4b   : > { %v323_v1 = vrot.slane %v322_v58, 1  ;;  %v303_v2 = vsel %vm302_vm6, %v288_v59, %v301_v63  ;;  %v329_v3 = vadd.f32 %v328_v61, %v327_v53  ;;  %vm244_vm9 = vcmask 11264  }
  0x4c   : > { %v336_v4 = vadd.f32 %v335_v62, %v334_v54  ;;  %v305_v5 = vsel %vm304_vm7, %v295_v60, %v303_v2  ;;  %v317_v6 = vadd.f32 %v316_v0, %v315_v57  ;;  %v665_v17 = vmov 0.0  }
  0x4d   : > { %v324_v7 = vadd.f32 %v323_v1, %v322_v58  ;;  %v308_v8 = vsel %vm307_vm8, %v305_v5, 0.0  ;;  %v330_v9 = vrot.slane %v329_v3, 1  ;;  %245 = vst.msk [vmem:[%s239_s18] sm:$0xf] %vm244_vm9, %v665_v17  ;;  %vm350_vm10 = vcmask 7168  }
  0x4e   : > { %v337_v10 = vrot.slane %v336_v4, 1  ;;  %309 = vadd.xlane.f32.xlu0 %v308_v8 }
  0x4f   : > { %v343_v11 = vsel %vm300_vm5, %v324_v7, %v317_v6  ;;  %v331_v12 = vadd.f32 %v330_v9, %v329_v3 }
  0x50   : > { %v338_v13 = vadd.f32 %v337_v10, %v336_v4 }
  0x51   : > { %v344_v14 = vsel %vm302_vm6, %v331_v12, %v343_v11 }
  0x52   : > { %v345_v15 = vsel %vm304_vm7, %v338_v13, %v344_v14 }
  0x53   : > { %v347_v16 = vsel %vm307_vm8, %v345_v15, 0.0 }
  0x54   : > { %348 = vadd.xlane.f32.xlu0 %v347_v16  ;;  %v352_v19 = vld [vmem:[%s239_s18] sm:$0xf] }
  0xd7   : > { %v310_v18 = vpop.xlane.xlu0 %309 }
  0xdd   : > { %v349_v20 = vpop.xlane.xlu0 %348 }
  0xde   : > { %v351_v21 = vsel %vm350_vm10, %v310_v18, %v349_v20 }
  0xdf   : > { %v353_v22 = vadd.f32 %v352_v19, %v351_v21 }
  0xe1   : > { %355 = vst.msk [vmem:[%s239_s18] sm:$0xf] %vm244_vm9, %v353_v22 }
  0xe2 PF: > { %s18_s14 = sadd.s32 1, %s659_s14   ;;  %s840_s9 = smov %s643_s10 }
  0xe3   : > { %p15_p9 = scmp.ge.s32.totalorder %s18_s14, 4   ;;  %s841_s10 = smov %s647_s11 }
  0xe4   : > { %s842_s11 = smov %s730_s21  ;;  %s843_s12 = smov %s655_s13 }
  0xe5   : > { %s844_s13 = smov %s846_s16  ;;  %17 = sbr.rel (!%p15_p9) target bundleno = 6 (0x6), region = 85 }
  0xea   :  { %381 = vsyncpa [#allocation3], 1 }
  0xeb   :  { %383 = vsyncpa [#allocation3 + $0x1], 1 }
  0xec   :  { %384 = vsyncpa [#allocation5], 1 }
  0xed   :  { %386 = vsyncpa [#allocation5 + $0x1], 1 }

</bundles_post_ra>
